<compile_context>
chip_gen: v7x
topology: tpu7x:2x2x1
jax: 0.10.0
libtpu: 0.0.40
codegen_flags: <defaults>
</compile_context>

<pallas_src>
import functools

import jax
import jax.numpy as jnp
from jax import lax
from jax.experimental import pallas as pl
from jax.experimental.pallas import tpu as pltpu


def _round_up(x, m):
    return ((x + m - 1) // m) * m


def _choose_class_tile(C):
    """Class-chunk width for the blocked triangular-matmul cumsum."""
    if C <= 256:
        return C
    for tc in (256, 128):          # native MXU widths on v6e/v7x (256) / v5e (128)
        if C % tc == 0:
            return tc
    return C                       # fallback: single full-width chunk (correctness first)


def _choose_batch_tile(B, C):
    """Batch-tile rows; keep double-buffered f32 input tiles ~<= 8 MiB VMEM."""
    budget = 8 * 1024 * 1024
    cap_rows = max(8, (budget // (4 * 4 * max(C, 1))) // 8 * 8)
    return min(512, cap_rows, _round_up(B, 8))


def _emd_kernel(x_ref, y_ref, o_ref, tri_ref, *, r, inv_c, batch, tb, tc, n_chunks):
    i = pl.program_id(0)

    # Build the tc x tc upper-triangular ones tile once; it lives in VMEM
    # scratch and persists across grid steps (grid axis is "arbitrary").
    @pl.when(i == 0)
    def _():
        row = lax.broadcasted_iota(jnp.int32, (tc, tc), 0)
        col = lax.broadcasted_iota(jnp.int32, (tc, tc), 1)
        tri_ref[...] = jnp.where(row <= col, 1.0, 0.0).astype(jnp.float32)

    # Mask for tail rows of the last (possibly partial) batch tile.
    row_ids = lax.broadcasted_iota(jnp.int32, (tb, 1), 0) + i * tb
    valid = row_ids < batch

    tri = tri_ref[...]
    carry = jnp.zeros((tb, 1), jnp.float32)    # running cumsum carry per row
    pow_acc = jnp.zeros((tb, 1), jnp.float32)  # sum over classes of |cdf|^r

    for k in range(n_chunks):                  # static loop, static slices
        lo = k * tc
        d = (x_ref[:, lo:lo + tc].astype(jnp.float32)
             - y_ref[:, lo:lo + tc].astype(jnp.float32))
        d = jnp.where(valid, d, 0.0)           # zero out out-of-range rows
        cdf = jnp.dot(d, tri, preferred_element_type=jnp.float32)
        if k > 0:
            cdf = cdf + carry
        if r == 2.0:
            powed = cdf * cdf                  # VPU mul, no EUP pow
        elif r == 1.0:
            powed = jnp.abs(cdf)
        else:
            powed = jnp.power(jnp.abs(cdf), r)
        pow_acc = pow_acc + jnp.sum(powed, axis=-1, keepdims=True)
        if k + 1 < n_chunks:
            carry = carry + jnp.sum(d, axis=-1, keepdims=True)

    mean_pow = pow_acc * inv_c                 # multiply by precomputed 1/C
    if r == 2.0:
        class_wise = jnp.sqrt(mean_pow)
    elif r == 1.0:
        class_wise = mean_pow
    else:
        class_wise = jnp.power(mean_pow, 1.0 / r)

    # Partial sum of class_wise over this batch tile (masked rows contribute 0).
    o_ref[i, 0] = jnp.sum(class_wise)


def earth_mover_distance(inp, tgt, r: float = 2.0):
    """inp, tgt: (B, num_classes) arrays. Returns a scalar jnp.float32."""
    B, C = inp.shape
    assert tgt.shape == (B, C)
    r = float(r)

    tc = _choose_class_tile(C)
    n_chunks = C // tc
    tb = _choose_batch_tile(B, C)
    num_tiles = pl.cdiv(B, tb)

    kernel = functools.partial(
        _emd_kernel, r=r, inv_c=1.0 / C, batch=B, tb=tb, tc=tc, n_chunks=n_chunks)

    partials = pl.pallas_call(
        kernel,
        out_shape=jax.ShapeDtypeStruct((num_tiles, 1), jnp.float32),
        grid=(num_tiles,),
        in_specs=[
            pl.BlockSpec((tb, C), lambda i: (i, 0)),
            pl.BlockSpec((tb, C), lambda i: (i, 0)),
        ],
        out_specs=pl.BlockSpec(memory_space=pltpu.SMEM),
        scratch_shapes=[pltpu.VMEM((tc, tc), jnp.float32)],
        compiler_params=pltpu.CompilerParams(
            dimension_semantics=("arbitrary",)),
    )(inp, tgt)

    # Final batch-mean done in the wrapper (partials already exclude masked rows).
    return (jnp.sum(partials) * (1.0 / B)).astype(jnp.float32)


class EarthMoverDistanceLoss:
    def __init__(self, r: float = 2.0):
        self.r = r

    def __call__(self, inp, tgt):
        return earth_mover_distance(inp, tgt, r=self.r)


def _reference(inp, tgt, r=2.0):
    ic = jnp.cumsum(inp, axis=-1)
    tc = jnp.cumsum(tgt, axis=-1)
    diff = jnp.abs(ic - tc) ** r
    cw = (jnp.sum(diff, axis=-1) / inp.shape[1]) ** (1.0 / r)
    return jnp.sum(cw) / inp.shape[0]


if __name__ == "__main__":
    key = jax.random.PRNGKey(0)
    k1, k2 = jax.random.split(key)
    B, C = 8, 16  # small shapes consistent with (B, num_classes) inputs

    # Make them look like probability distributions (softmax), as the loss expects.
    logits_in = jax.random.normal(k1, (B, C), dtype=jnp.float32)
    logits_tg = jax.random.normal(k2, (B, C), dtype=jnp.float32)
    x = jax.nn.softmax(logits_in, axis=-1)
    y = jax.nn.softmax(logits_tg, axis=-1)

    loss_fn = EarthMoverDistanceLoss(r=2.0)
    out = loss_fn(x, y)
    jax.block_until_ready(out)

    ref = _reference(x, y, r=2.0)
    assert jnp.allclose(out, ref, atol=1e-5, rtol=1e-5), (out, ref)

    print("KERNEL_OK")
</pallas_src>

<mosaic_0001>
module attributes {stable_mosaic.version = 11 : i64} {
  func.func @_emd_kernel(%arg0: i32, %arg1: memref<8x16xf32, #tpu.memory_space<vmem>>, %arg2: memref<8x16xf32, #tpu.memory_space<vmem>>, %arg3: memref<1x1xf32, #tpu.memory_space<smem>>, %arg4: memref<16x16xf32, #tpu.memory_space<vmem>>) attributes {dimension_semantics = [#tpu.dimension_semantics<arbitrary>], iteration_bounds = array<i64: 1>, scalar_prefetch = 0 : i64, scratch_operands = 1 : i64, tpu.core_type = #tpu.core_type<tc>, window_params = [{transform_indices = @transform_0, window_bounds = array<i64: 8, 16>}, {transform_indices = @transform_1, window_bounds = array<i64: 8, 16>}, {transform_indices = @transform_2, window_bounds = array<i64: 1, 1>}]} {
    %c0_i32 = arith.constant 0 : i32
    %0 = arith.cmpi eq, %arg0, %c0_i32 : i32
    %1 = arith.extui %0 : i1 to i32
    %c0_i32_0 = arith.constant 0 : i32
    %2 = arith.cmpi ne, %1, %c0_i32_0 : i32
    scf.if %2 {
      %32 = tpu.iota {dimensions = array<i32: 0>} : vector<16x16xi32>
      %33 = tpu.iota {dimensions = array<i32: 1>} : vector<16x16xi32>
      %34 = arith.cmpi sle, %32, %33 : vector<16x16xi32>
      %cst_13 = arith.constant 1.000000e+00 : f32
      %cst_14 = arith.constant 0.000000e+00 : f32
      %35 = vector.broadcast %cst_13 : f32 to vector<16x16xf32>
      %36 = vector.broadcast %cst_14 : f32 to vector<16x16xf32>
      %37 = arith.select %34, %35, %36 : vector<16x16xi1>, vector<16x16xf32>
      %c0_15 = arith.constant 0 : index
      %c0_16 = arith.constant 0 : index
      %38 = vector.load %arg4[%c0_15, %c0_16] : memref<16x16xf32, #tpu.memory_space<vmem>>, vector<16x16xf32>
      tpu.vector_store %arg4[%c0_15, %c0_16], %37 {strides = array<i32>} : memref<16x16xf32, #tpu.memory_space<vmem>>, vector<16x16xf32>,
    } else {
    }
    %3 = tpu.iota {dimensions = array<i32: 0>} : vector<8x1xi32>
    %c8_i32 = arith.constant 8 : i32
    %4 = arith.muli %arg0, %c8_i32 : i32
    %5 = vector.broadcast %4 : i32 to vector<8x1xi32>
    %6 = arith.addi %3, %5 : vector<8x1xi32>
    %c8_i32_1 = arith.constant 8 : i32
    %7 = vector.broadcast %c8_i32_1 : i32 to vector<8x1xi32>
    %8 = arith.cmpi slt, %6, %7 : vector<8x1xi32>
    %c0 = arith.constant 0 : index
    %c0_2 = arith.constant 0 : index
    %9 = vector.load %arg4[%c0, %c0_2] : memref<16x16xf32, #tpu.memory_space<vmem>>, vector<16x16xf32>
    %cst = arith.constant 0.000000e+00 : f32
    %10 = vector.broadcast %cst : f32 to vector<8x1xf32>
    %c0_3 = arith.constant 0 : index
    %c0_4 = arith.constant 0 : index
    %11 = vector.load %arg1[%c0_3, %c0_4] : memref<8x16xf32, #tpu.memory_space<vmem>>, vector<8x16xf32>
    %c0_5 = arith.constant 0 : index
    %c0_6 = arith.constant 0 : index
    %12 = vector.load %arg2[%c0_5, %c0_6] : memref<8x16xf32, #tpu.memory_space<vmem>>, vector<8x16xf32>
    %13 = arith.subf %11, %12 : vector<8x16xf32>
    %cst_7 = arith.constant 0.000000e+00 : f32
    %14 = vector.shape_cast %8 : vector<8x1xi1> to vector<8x1xi1>
    %15 = vector.broadcast %14 : vector<8x1xi1> to vector<8x16xi1>
    %16 = vector.broadcast %cst_7 : f32 to vector<8x16xf32>
    %17 = arith.select %15, %13, %16 : vector<8x16xi1>, vector<8x16xf32>
    %cst_8 = arith.constant dense<0.000000e+00> : vector<8x16xf32>
    %18 = tpu.matmul %17, %9, %cst_8 {dimension_numbers = #tpu.dot_dimension_numbers<[1], [0], [0], [1], [0, 0, 1, 1], [], []>} : vector<8x16xf32>, vector<16x16xf32>, vector<8x16xf32> -> vector<8x16xf32>
    %19 = arith.mulf %18, %18 : vector<8x16xf32>
    %cst_9 = arith.constant dense<0.000000e+00> : vector<8xf32>
    %20 = vector.multi_reduction <add>, %19, %cst_9 [1] : vector<8x16xf32> to vector<8xf32>
    %21 = vector.shape_cast %20 : vector<8xf32> to vector<8x1xf32>
    %22 = arith.addf %10, %21 : vector<8x1xf32>
    %cst_10 = arith.constant 6.250000e-02 : f32
    %23 = vector.broadcast %cst_10 : f32 to vector<8x1xf32>
    %24 = arith.mulf %22, %23 : vector<8x1xf32>
    %25 = math.sqrt %24 : vector<8x1xf32>
    %26 = vector.shape_cast %25 : vector<8x1xf32> to vector<1x8x1xf32>
    %cst_11 = arith.constant dense<0.000000e+00> : vector<1xf32>
    %27 = vector.multi_reduction <add>, %26, %cst_11 [1, 2] : vector<1x8x1xf32> to vector<1xf32>
    %28 = vector.shape_cast %27 : vector<1xf32> to vector<1x1x1xf32>
    %29 = vector.extract %28[0, 0, 0] : f32 from vector<1x1x1xf32>
    %30 = arith.index_cast %arg0 : i32 to index
    %c0_12 = arith.constant 0 : index
    %31 = memref.load %arg3[%30, %c0_12] : memref<1x1xf32, #tpu.memory_space<smem>>
    memref.store %29, %arg3[%30, %c0_12] : memref<1x1xf32, #tpu.memory_space<smem>>
    return
  }
  func.func @transform_0(%arg0: i32) -> (i32, i32) {
    %c0_i32 = arith.constant 0 : i32
    %c0_i32_0 = arith.constant 0 : i32
    return %arg0, %c0_i32 : i32, i32
  }
  func.func @transform_1(%arg0: i32) -> (i32, i32) {
    %c0_i32 = arith.constant 0 : i32
    %c0_i32_0 = arith.constant 0 : i32
    return %arg0, %c0_i32 : i32, i32
  }
  func.func @transform_2(%arg0: i32) -> (i32, i32) {
    %c0_i32 = arith.constant 0 : i32
    %c0_i32_0 = arith.constant 0 : i32
    %c0_i32_1 = arith.constant 0 : i32
    return %c0_i32, %c0_i32_0 : i32, i32
  }
}

</mosaic_0001>

<bundles_post_ra>
// kernel: tpu_custom_call.1
= control target key start
LH: loop header
LB: loop body
LE: loop exit
PB: predicated region body
PF: predicated region fallthrough
CT: control target
= control target key end

     0   :  { %7 = vsyncpa [#allocation4], 0  ;;  %s327_s0 = inlined_call_operand.hbm [shape: f32[8,16], index: 0, kind: input, shape index: {}]   ;;  %s328_s1 = inlined_call_operand.hbm [shape: f32[8,16], index: 1, kind: input, shape index: {}]   ;;  %s329_s2 = inlined_call_operand.hbm [shape: f32[1,1], index: 2, kind: output, shape index: {}]  }
   0x1   :  { %8 = vsyncpa [#allocation7], 0 }
   0x2   :  { %9 = vsyncpa [#allocation5], 0  ;;  %s266_s9 = smov [#allocation3]   ;;  %s267_s11 = smov [#allocation6]  }
   0x3   :  { %s16_s10 = sshll.u32 %s266_s9, 4  ;;  %s26_s12 = sshll.u32 %s267_s11, 4  ;;  %s17_s10 = int_to_ptr.vmem [resolvable:$true] %s16_s10  ;;  %s27_s12 = int_to_ptr.vmem [resolvable:$true] %s26_s12 }
   0x4   :  { %s206_s15 = scalar_lea.hbm %s327_s0, 128 }
   0x5   :  { %p207_p0 = scmp.ne.s32.totalorder %s327_s0, %s206_s15  ;;  %p210_p1 = scmp.lt.u32.totalorder %s206_s15, %s327_s0 }
   0x7   :  { %p212_p2 = pnand %p210_p1, %p207_p0 }
   0x9   :  { %215 = shalt.err (!%p212_p2)
}
   0xa   :  { %s216_s20 = scalar_lea.vmem %s17_s10, 128  ;;  %p221_p4 = scmp.lt.s32.totalorder %s17_s10, %s17_s10 }
   0xb   :  { %p217_p3 = scmp.ne.s32.totalorder %s17_s10, %s216_s20  ;;  %p222_p5 = scmp.lt.s32.totalorder %s216_s20, %s216_s20 }
   0xd   :  { %p223_p6 = por %p222_p5, %p221_p4 }
   0xf   :  { %p224_p7 = pnand %p223_p6, %p217_p3 }
  0x11   :  { %227 = shalt.err (!%p224_p7)
}
  0x12   :  { %19 = dma.hbm_to_vmem [thread:$0]  %s327_s0, 128, %s17_s10, [#allocation4]  }
  0x13   :  { %s228_s25 = scalar_lea.hbm %s328_s1, 128 }
  0x14   :  { %p229_p8 = scmp.ne.s32.totalorder %s328_s1, %s228_s25  ;;  %p232_p9 = scmp.lt.u32.totalorder %s228_s25, %s328_s1 }
  0x16   :  { %p234_p10 = pnand %p232_p9, %p229_p8 }
  0x18   :  { %237 = shalt.err (!%p234_p10)
}
  0x19   :  { %s238_s30 = scalar_lea.vmem %s27_s12, 128  ;;  %p243_p12 = scmp.lt.s32.totalorder %s27_s12, %s27_s12 }
  0x1a   :  { %p239_p11 = scmp.ne.s32.totalorder %s27_s12, %s238_s30  ;;  %p244_p13 = scmp.lt.s32.totalorder %s238_s30, %s238_s30 }
  0x1c   :  { %p245_p0 = por %p244_p13, %p243_p12 }
  0x1e   :  { %p246_p1 = pnand %p245_p0, %p239_p11 }
  0x20   :  { %249 = shalt.err (!%p246_p1)
}
  0x21   :  { %29 = dma.hbm_to_vmem [thread:$0]  %s328_s1, 128, %s27_s12, [#allocation7]  }
  0x22   :  { %260 = dma.done.wait [#allocation4], 128  }
  0x23   :  { %261 = vsyncadd [#allocation4], 4294967168 }
  0x24   :  { %262 = dma.done.wait [#allocation7], 128  }
  0x25   :  { %263 = vsyncadd [#allocation7], 4294967168  ;;  %v40_v0 = vlaneseq  ;;  %v268_v1 = vmov 0.0|0.0   ;;  %vm269_vm0 = vmmov 0   ;;  %v270_v4 = vmov 0.0   ;;  %v60_v9 = vld [vmem:[#allocation3] sm:$0xff] }
  0x26   :  { %193 = vmatprep.subr.bf16.mxu0 %v268_v1  ;;  %190 = vmatprep.mubr.msk.f32.mxu0 %vm269_vm0, %v270_v4  ;;  %vm49_vm1 = vcmask 130048   ;;  %v61_v10 = vld [vmem:[#allocation6] sm:$0xff]  ;;  %vm153_vm5 = vcmask 7168   ;;  %s250_s6 = scalar_lea.hbm %s329_s2, 16 }
  0x27   :  { %v41_v2 = vshrl.u32 %v40_v0, 7  ;;  %v44_v3 = vand.u32 127, %v40_v0  ;;  %v62_v13 = vsub.f32 %v60_v9, %v61_v10  ;;  %p251_p2 = scmp.ne.s32.totalorder %s329_s2, %s250_s6  ;;  %p254_p3 = scmp.lt.u32.totalorder %s250_s6, %s329_s2 }
  0x29   :  { %v42_v5 = vadd.s32 8, %v41_v2  ;;  %vm45_vm2 = vcmp.le.s32.totalorder %v41_v2, %v44_v3  ;;  %p256_p4 = pnand %p254_p3, %p251_p2 }
  0x2a   :  { %v47_v6 = vsel %vm45_vm2, 1.0, %v270_v4 }
  0x2b   :  { %vm46_vm3 = vcmp.le.s32.totalorder %v42_v5, %v44_v3  ;;  %50 = vst.msk [vmem:[#allocation2] sm:$0xff] %vm49_vm1, %v47_v6 }
  0x2c   :  { %v48_v7 = vsel %vm46_vm3, 1.0, %v270_v4 }
  0x2d   :  { %51 = vst.msk [vmem:[#allocation2 + $0x8] sm:$0xff] %vm49_vm1, %v48_v7 }
  0x32   :  { %v58_v8 = vld [vmem:[#allocation2] sm:$0xff] }
  0x34   :  { %v59_v11 = vld [vmem:[#allocation2 + $0x8] sm:$0xff] }
  0x35   :  { %v194_v12 = vpack.c.bf16 %v59_v11, %v58_v8 }
  0x37   :  { %195 = vmatpush3.bf16.msra.mxu0 %v194_v12 }
  0x3a   :  { %191 = vmatmul.mubr.msk.f32.vlgmr.msra.gmra.mrb[0].mxu0 %vm49_vm1, %v62_v13 }
 0x10d   :  { %v136_v14 = vpop.f32.mrb[0].mxu0 }
 0x10e   :  { %v140_v15 = vmul.f32 %v136_v14, %v136_v14  ;;  %v192_v16 = vpop.f32.mrb[1].mxu0 }
 0x110   :  { %v141_v17 = vsel %vm49_vm1, %v140_v15, 0.0 }
 0x111   :  { %142 = vadd.xlane.f32.xlu0 %v141_v17 }
 0x19e   :  { %v143_v18 = vpop.xlane.xlu0 %142 }
 0x19f   :  { %v145_v19 = vmul.f32 0.0625, %v143_v18 }
 0x1a1   :  { %204 = vrsqrt.f32 %v145_v19  ;;  %vm148_vm4 = vcmp.eq.f32.partialorder %v145_v19, inf  ;;  %v151_v22 = vand.u32 2147483648, %v145_v19  ;;  %vm150_vm6 = vcmp.eq.f32.partialorder %v145_v19, 0.0 }
 0x1ab   :  { %v205_v20 = vpop.eup %204 }
 0x1ac   :  { %v147_v21 = vmul.f32 %v205_v20, %v145_v19 }
 0x1ae   :  { %v149_v23 = vsel %vm148_vm4, %v145_v19, %v147_v21 }
 0x1af   :  { %v152_v24 = vsel %vm150_vm6, %v151_v22, %v149_v23 }
 0x1b0   :  { %v154_v25 = vsel %vm153_vm5, %v152_v24, 0.0 }
 0x1b1   :  { %155 = vadd.xlane.f32.xlu0 %v154_v25 }
 0x23e   :  { %v156_v26 = vpop.xlane.xlu0 %155 }
 0x23f   :  { %v157_v27 = vrot.slane %v156_v26, 4 }
 0x241   :  { %v158_v28 = vadd.f32 %v157_v27, %v156_v26 }
 0x243   :  { %v159_v29 = vrot.slane %v158_v28, 2 }
 0x245   :  { %v160_v30 = vadd.f32 %v159_v29, %v158_v28 }
 0x247   :  { %v161_v31 = vrot.slane %v160_v30, 1 }
 0x249   :  { %v162_v32 = vadd.f32 %v161_v31, %v160_v30 }
 0x24b   :  { %196 = vpush %v162_v32 }
 0x27c   :  { %s197_s1 = spop %196 }
 0x27d   :  { %166 = sst [smem:[#allocation8]] %s197_s1 }
 0x27e   :  { %259 = shalt.err (!%p256_p4)
}
 0x27f   :  { %s271_s11 = smov [#allocation8]  }
 0x280   :  { %174 = dma.smem_to_hbm %s271_s11, 16, %s329_s2, [#allocation5]  }
 0x281   :  { %264 = dma.done.wait [#allocation5], 16  }
 0x282   :  { %265 = vsyncadd [#allocation5], 4294967280 }
 0x283   :  { %178 = sfence }
 0x284   :  { %179 = vsyncpa [#allocation4], 1 }
 0x285   :  { %180 = vsyncpa [#allocation7], 1 }
 0x286   :  { %181 = vsyncpa [#allocation5], 1 }

</bundles_post_ra>
